<compile_context>
chip_gen: v6e
topology: v6e:2x2x1
jax: 0.10.0
libtpu: 0.0.40
codegen_flags: <defaults>
</compile_context>

<pallas_src>
import jax
import jax.numpy as jnp
from jax import lax
from jax.experimental import pallas as pl
from jax.experimental.pallas import tpu as pltpu


# ----------------------------- Pallas kernel --------------------------------
def conpole_encoder_kernel(idx_ref, table_ref, w_ref, b_ref, mu_ref, lv_ref):
    """One grid step:
         1) on-chip gather of tile_n embedding rows via a one-hot MXU pass
            against the VMEM-resident bf16 table,
         2) one fused bf16 MXU matmul producing [mu | logvar] with f32
            accumulation + f32 bias, split into the two outputs."""
    tile_n = idx_ref.shape[0]
    p = table_ref.shape[0]
    f_out = mu_ref.shape[1]

    # ---- gather: one_hot(idx) @ table  (exact — a single 1.0 per row) ------
    idx = idx_ref[...]                                           # (tile_n, 1) i32
    row_ids = lax.broadcasted_iota(jnp.int32, (tile_n, p), 1)    # (tile_n, P)
    one_hot = (idx == row_ids).astype(jnp.bfloat16)              # (tile_n, P) bf16
    emb = jnp.dot(one_hot, table_ref[...],
                  preferred_element_type=jnp.float32).astype(jnp.bfloat16)

    # ---- fused [mu | logvar] linear: bf16 MXU, f32 acc, f32 bias -----------
    acc = jnp.dot(emb, w_ref[...], preferred_element_type=jnp.float32)
    acc = acc + b_ref[...]                                       # (tile_n, 2F) f32
    mu_ref[...] = acc[:, :f_out]
    lv_ref[...] = acc[:, f_out:]


# ----------------------------- parameter prep (once) ------------------------
def fuse_encoder_params(embed_table, w_mu, b_mu, w_lv, b_lv):
    """One-time prep, outside the per-call path: bf16 table, fused (E, 2F)
    bf16 weight and (1, 2F) f32 bias for a single MXU pass per row tile."""
    table_bf16 = embed_table.astype(jnp.bfloat16)                          # (P, E)
    w_fused = jnp.concatenate([w_mu.T, w_lv.T], axis=1).astype(jnp.bfloat16)   # (E, 2F)
    b_fused = jnp.concatenate([b_mu, b_lv]).reshape(1, -1).astype(jnp.float32)  # (1, 2F)
    return table_bf16, w_fused, b_fused


# ----------------------------- wrapper ---------------------------------------
def conpole_encoder(flat_index, table_bf16, w_fused, b_fused, *, max_tile_n=256):
    """flat_index: (N,) int indices into table_bf16 (P, E).
    w_fused: (E, 2F) bf16, b_fused: (1, 2F) f32 (from fuse_encoder_params).
    Returns (mu, logvar), each (N, F) float32."""
    N = int(flat_index.shape[0])
    P, E = table_bf16.shape
    two_f = w_fused.shape[1]
    f_out = two_f // 2

    if N == 0:  # guard: empty batch
        z = jnp.zeros((0, f_out), jnp.float32)
        return z, z

    # Row tiling: up to 256 rows per MXU pass; pad N (index 0) to a multiple
    # of tile_n so any batch size works.  Padded garbage rows are sliced off.
    tile_n = min(max_tile_n, max(8, pl.cdiv(N, 8) * 8))
    n_tiles = pl.cdiv(N, tile_n)
    n_pad = n_tiles * tile_n
    idx = jnp.zeros((n_pad, 1), jnp.int32).at[:N, 0].set(flat_index.astype(jnp.int32))

    # NOTE: the table is VMEM-resident (P*E*2 bytes).  For very large tables
    # (P*E*2 beyond the VMEM budget, esp. v7x's 64 MiB) a DMA-gather fallback
    # would be needed; at ConpoleEncoder scales the table is a few KiB-MiB.
    mu, logvar = pl.pallas_call(
        conpole_encoder_kernel,
        out_shape=(jax.ShapeDtypeStruct((n_pad, f_out), jnp.float32),
                   jax.ShapeDtypeStruct((n_pad, f_out), jnp.float32)),
        grid_spec=pltpu.PrefetchScalarGridSpec(
            num_scalar_prefetch=0,
            grid=(n_tiles,),
            in_specs=[
                pl.BlockSpec((tile_n, 1), lambda i: (i, 0)),   # per-tile indices
                pl.BlockSpec((P, E), lambda i: (0, 0)),        # resident bf16 table
                pl.BlockSpec((E, two_f), lambda i: (0, 0)),    # resident fused W
                pl.BlockSpec((1, two_f), lambda i: (0, 0)),    # resident fused b
            ],
            out_specs=[
                pl.BlockSpec((tile_n, f_out), lambda i: (i, 0)),
                pl.BlockSpec((tile_n, f_out), lambda i: (i, 0)),
            ],
        ),
        compiler_params=pltpu.CompilerParams(
            dimension_semantics=("parallel",)),
    )(idx, table_bf16, w_fused, b_fused)

    if n_pad != N:
        mu, logvar = mu[:N], logvar[:N]
    return mu, logvar


# ----------------------------- driver ----------------------------------------
if __name__ == "__main__":
    key = jax.random.PRNGKey(0)

    # Small shapes consistent with the module (module default E=512; small here).
    num_problems  = 16
    embedding_dim = 128
    item_feat_dim = 128
    batch_shape   = (2, 4)   # item_index shape before .flatten()

    k_emb, k_wmu, k_bmu, k_wlv, k_blv, k_idx = jax.random.split(key, 6)

    # TODO(synk): q_fn.embed_states / environment.State have no Pallas
    # equivalent — replaced by a deterministic synthetic embedding table.
    embed_table = jax.random.normal(
        k_emb, (num_problems, embedding_dim), dtype=jnp.float32)

    # Deterministic Linear params (mimic nn.Linear uniform(-1/sqrt(E), 1/sqrt(E))).
    bound = 1.0 / (embedding_dim ** 0.5)
    w_mu = jax.random.uniform(k_wmu, (item_feat_dim, embedding_dim),
                              minval=-bound, maxval=bound, dtype=jnp.float32)
    b_mu = jax.random.uniform(k_bmu, (item_feat_dim,),
                              minval=-bound, maxval=bound, dtype=jnp.float32)
    w_lv = jax.random.uniform(k_wlv, (item_feat_dim, embedding_dim),
                              minval=-bound, maxval=bound, dtype=jnp.float32)
    b_lv = jax.random.uniform(k_blv, (item_feat_dim,),
                              minval=-bound, maxval=bound, dtype=jnp.float32)

    # item_index (indices into problems), flattened like the module does.
    item_index = jax.random.randint(k_idx, batch_shape, 0, num_problems)
    flat_index = item_index.reshape(-1)

    # One-time parameter prep (outside the per-call path).
    table_bf16, w_fused, b_fused = fuse_encoder_params(
        embed_table, w_mu, b_mu, w_lv, b_lv)

    mu, logvar = conpole_encoder(flat_index, table_bf16, w_fused, b_fused)
    jax.block_until_ready((mu, logvar))

    # Reference (same math as the torch module).  Loose tolerance: the kernel
    # feeds the MXU bf16 table/weights (f32 accumulation, f32 bias).
    item_embedding = jnp.take(embed_table, flat_index, axis=0)
    mu_ref = item_embedding @ w_mu.T + b_mu
    lv_ref = item_embedding @ w_lv.T + b_lv

    assert mu.shape == (flat_index.shape[0], item_feat_dim)
    assert logvar.shape == (flat_index.shape[0], item_feat_dim)
    assert jnp.allclose(mu, mu_ref, atol=2e-2, rtol=2e-2)
    assert jnp.allclose(logvar, lv_ref, atol=2e-2, rtol=2e-2)

    print("KERNEL_OK")
</pallas_src>

<mosaic_0001>
module attributes {stable_mosaic.version = 11 : i64} {
  func.func @conpole_encoder_kernel(%arg0: i32, %arg1: memref<8x1xi32, #tpu.memory_space<vmem>>, %arg2: memref<16x128xbf16, #tpu.memory_space<vmem>>, %arg3: memref<128x256xbf16, #tpu.memory_space<vmem>>, %arg4: memref<1x256xf32, #tpu.memory_space<vmem>>, %arg5: memref<8x128xf32, #tpu.memory_space<vmem>>, %arg6: memref<8x128xf32, #tpu.memory_space<vmem>>) attributes {dimension_semantics = [#tpu.dimension_semantics<parallel>], iteration_bounds = array<i64: 1>, scalar_prefetch = 0 : i64, scratch_operands = 0 : i64, tpu.core_type = #tpu.core_type<tc>, window_params = [{transform_indices = @transform_0, window_bounds = array<i64: 8, 1>}, {pipeline_mode = #tpu.pipeline_mode<synchronous>, transform_indices = @transform_1, window_bounds = array<i64: 16, 128>}, {pipeline_mode = #tpu.pipeline_mode<synchronous>, transform_indices = @transform_2, window_bounds = array<i64: 128, 256>}, {pipeline_mode = #tpu.pipeline_mode<synchronous>, transform_indices = @transform_3, window_bounds = array<i64: 1, 256>}, {transform_indices = @transform_4, window_bounds = array<i64: 8, 128>}, {transform_indices = @transform_5, window_bounds = array<i64: 8, 128>}]} {
    %c0 = arith.constant 0 : index
    %c0_0 = arith.constant 0 : index
    %0 = vector.load %arg1[%c0, %c0_0] : memref<8x1xi32, #tpu.memory_space<vmem>>, vector<8x1xi32>
    %1 = tpu.iota {dimensions = array<i32: 1>} : vector<8x16xi32>
    %2 = vector.broadcast %0 : vector<8x1xi32> to vector<8x16xi32>
    %3 = arith.cmpi eq, %2, %1 : vector<8x16xi32>
    %4 = arith.extui %3 : vector<8x16xi1> to vector<8x16xi32>
    %5 = arith.sitofp %4 : vector<8x16xi32> to vector<8x16xf32>
    %6 = arith.truncf %5 : vector<8x16xf32> to vector<8x16xbf16>
    %c0_1 = arith.constant 0 : index
    %c0_2 = arith.constant 0 : index
    %7 = vector.load %arg2[%c0_1, %c0_2] : memref<16x128xbf16, #tpu.memory_space<vmem>>, vector<16x128xbf16>
    %cst = arith.constant dense<0.000000e+00> : vector<8x128xf32>
    %8 = tpu.matmul %6, %7, %cst {dimension_numbers = #tpu.dot_dimension_numbers<[1], [0], [0], [1], [0, 0, 1, 1], [], []>} : vector<8x16xbf16>, vector<16x128xbf16>, vector<8x128xf32> -> vector<8x128xf32>
    %9 = arith.truncf %8 : vector<8x128xf32> to vector<8x128xbf16>
    %c0_3 = arith.constant 0 : index
    %c0_4 = arith.constant 0 : index
    %10 = vector.load %arg3[%c0_3, %c0_4] : memref<128x256xbf16, #tpu.memory_space<vmem>>, vector<128x256xbf16>
    %cst_5 = arith.constant dense<0.000000e+00> : vector<8x256xf32>
    %11 = tpu.matmul %9, %10, %cst_5 {dimension_numbers = #tpu.dot_dimension_numbers<[1], [0], [0], [1], [0, 0, 1, 1], [], []>} : vector<8x128xbf16>, vector<128x256xbf16>, vector<8x256xf32> -> vector<8x256xf32>
    %c0_6 = arith.constant 0 : index
    %c0_7 = arith.constant 0 : index
    %12 = vector.load %arg4[%c0_6, %c0_7] : memref<1x256xf32, #tpu.memory_space<vmem>>, vector<1x256xf32>
    %13 = vector.broadcast %12 : vector<1x256xf32> to vector<8x256xf32>
    %14 = arith.addf %11, %13 : vector<8x256xf32>
    %15 = vector.extract_strided_slice %14 {offsets = [0, 0], sizes = [8, 128], strides = [1, 1]} : vector<8x256xf32> to vector<8x128xf32>
    %c0_8 = arith.constant 0 : index
    %c0_9 = arith.constant 0 : index
    %16 = vector.load %arg5[%c0_8, %c0_9] : memref<8x128xf32, #tpu.memory_space<vmem>>, vector<8x128xf32>
    tpu.vector_store %arg5[%c0_8, %c0_9], %15 {strides = array<i32>} : memref<8x128xf32, #tpu.memory_space<vmem>>, vector<8x128xf32>,
    %17 = vector.extract_strided_slice %14 {offsets = [0, 128], sizes = [8, 128], strides = [1, 1]} : vector<8x256xf32> to vector<8x128xf32>
    %c0_10 = arith.constant 0 : index
    %c0_11 = arith.constant 0 : index
    %18 = vector.load %arg6[%c0_10, %c0_11] : memref<8x128xf32, #tpu.memory_space<vmem>>, vector<8x128xf32>
    tpu.vector_store %arg6[%c0_10, %c0_11], %17 {strides = array<i32>} : memref<8x128xf32, #tpu.memory_space<vmem>>, vector<8x128xf32>,
    return
  }
  func.func @transform_0(%arg0: i32) -> (i32, i32) {
    %c0_i32 = arith.constant 0 : i32
    %c0_i32_0 = arith.constant 0 : i32
    return %arg0, %c0_i32 : i32, i32
  }
  func.func @transform_1(%arg0: i32) -> (i32, i32) {
    %c0_i32 = arith.constant 0 : i32
    %c0_i32_0 = arith.constant 0 : i32
    %c0_i32_1 = arith.constant 0 : i32
    return %c0_i32, %c0_i32_0 : i32, i32
  }
  func.func @transform_2(%arg0: i32) -> (i32, i32) {
    %c0_i32 = arith.constant 0 : i32
    %c0_i32_0 = arith.constant 0 : i32
    %c0_i32_1 = arith.constant 0 : i32
    return %c0_i32, %c0_i32_0 : i32, i32
  }
  func.func @transform_3(%arg0: i32) -> (i32, i32) {
    %c0_i32 = arith.constant 0 : i32
    %c0_i32_0 = arith.constant 0 : i32
    %c0_i32_1 = arith.constant 0 : i32
    return %c0_i32, %c0_i32_0 : i32, i32
  }
  func.func @transform_4(%arg0: i32) -> (i32, i32) {
    %c0_i32 = arith.constant 0 : i32
    %c0_i32_0 = arith.constant 0 : i32
    return %arg0, %c0_i32 : i32, i32
  }
  func.func @transform_5(%arg0: i32) -> (i32, i32) {
    %c0_i32 = arith.constant 0 : i32
    %c0_i32_0 = arith.constant 0 : i32
    return %arg0, %c0_i32 : i32, i32
  }
}

</mosaic_0001>

<bundles_post_ra>
// kernel: tpu_custom_call.1
= control target key start
LH: loop header
LB: loop body
LE: loop exit
PB: predicated region body
PF: predicated region fallthrough
CT: control target
= control target key end

     0   :  { %11 = vsyncpa [#allocation3], 0  ;;  %s462_s0 = inlined_call_operand.vmem [shape: s32[8,1], index: 0, kind: input, shape index: {}]   ;;  %s463_s1 = inlined_call_operand.vmem [shape: bf16[16,128], index: 1, kind: input, shape index: {}]   ;;  %s464_s2 = inlined_call_operand.hbm [shape: bf16[128,256], index: 2, kind: input, shape index: {}]   ;;  %s465_s3 = inlined_call_operand.vmem [shape: f32[1,256], index: 3, kind: input, shape index: {}]   ;;  %s466_s4 = inlined_call_operand.hbm [shape: f32[8,128], index: 4, kind: output, shape index: {0}]   ;;  %s467_s5 = inlined_call_operand.hbm [shape: f32[8,128], index: 5, kind: output, shape index: {1}]  }
   0x1   :  { %12 = vsyncpa [#allocation4], 0 }
   0x2   :  { %13 = vsyncpa [#allocation7], 0  ;;  %s406_s18 = smov [#allocation2]  }
   0x3   :  { %s23_s19 = sshll.u32 %s406_s18, 4  ;;  %s24_s19 = int_to_ptr.vmem [resolvable:$true] %s23_s19 }
   0x4   :  { %s348_s20 = scalar_lea.vmem %s24_s19, 2048  ;;  %p353_p1 = scmp.lt.s32.totalorder %s24_s19, %s24_s19 }
   0x5   :  { %p349_p0 = scmp.ne.s32.totalorder %s24_s19, %s348_s20  ;;  %p354_p2 = scmp.lt.s32.totalorder %s348_s20, %s348_s20 }
   0x7   :  { %p355_p3 = por %p354_p2, %p353_p1 }
   0x9   :  { %p356_p4 = pnand %p355_p3, %p349_p0 }
   0xb   :  { %359 = shalt.err (!%p356_p4)
}
   0xc   :  { %s407_s21 = smov 128   ;;  %s408_s22 = smov 8  }
   0xd   :  { %29 = dma.hbm_to_vmem [thread:$0]  %s464_s2, 2048, %s24_s19, [#allocation3], %s407_s21, %s407_s21, %s408_s22  }
   0xe   :  { %400 = dma.done.wait [#allocation3], 2048  }
   0xf   :  { %401 = vsyncadd [#allocation3], 4294965248  ;;  %v409_v0 = vmov 0   ;;  %v410_v1 = vmov 0.0   ;;  %v36_v2 = vld [vmem:[%s462_s0] sm:$0xff]  ;;  %vm411_vm0 = vmmov 0   ;;  %v37_v19 = vlaneseq }
  0x10   :  { %314 = vset.pattern.permute.xlu0 %v409_v0  ;;  %300 = vmatprep.subr.bf16.mxu0 %v410_v1  ;;  %v315_v3 = vld [vmem:[%s463_s1] sm:$0xff]   ;;  %v316_v4 = vld [vmem:[#allocation2 + $0x74] ss:$8 sps:$4 sm:$0xff]   ;;  %v318_v5 = vld [vmem:[#allocation2 + $0x70] ss:$8 sps:$4 sm:$0xff]   ;;  %vm54_vm2 = vcmask 130048  }
  0x11   :  { %239 = vmatprep.mubr.bf16.mxu1 %v409_v0  ;;  %302 = vmatprep.mubr.msk.bf16.mxu0 %vm411_vm0, %v410_v1  ;;  %v319_v6 = vld [vmem:[#allocation2 + $0x64] ss:$8 sps:$4 sm:$0xff]   ;;  %v321_v7 = vld [vmem:[#allocation2 + $0x60] ss:$8 sps:$4 sm:$0xff]   ;;  %v322_v8 = vld [vmem:[#allocation2 + $0x54] ss:$8 sps:$4 sm:$0xff]  }
  0x12   :  { %40 = vperm.xlu0 %314, %v36_v2   ;;  %301 = vmatpush3.bf16.msra.mxu0 %v315_v3  ;;  %v324_v9 = vld [vmem:[#allocation2 + $0x50] ss:$8 sps:$4 sm:$0xff]   ;;  %v325_v10 = vld [vmem:[#allocation2 + $0x44] ss:$8 sps:$4 sm:$0xff]   ;;  %v327_v11 = vld [vmem:[#allocation2 + $0x40] ss:$8 sps:$4 sm:$0xff]  }
  0x13   :  { %207 = vmatprep.subr.bf16.mxu1 %v316_v4  ;;  %v328_v12 = vld [vmem:[#allocation2 + $0x34] ss:$8 sps:$4 sm:$0xff]   ;;  %v330_v13 = vld [vmem:[#allocation2 + $0x30] ss:$8 sps:$4 sm:$0xff]   ;;  %v331_v14 = vld [vmem:[#allocation2 + $0x24] ss:$8 sps:$4 sm:$0xff]  }
  0x14   :  { %208 = vmatpush1.bf16.msra.mxu1 %v318_v5  ;;  %v333_v15 = vld [vmem:[#allocation2 + $0x20] ss:$8 sps:$4 sm:$0xff]   ;;  %v334_v16 = vld [vmem:[#allocation2 + $0x14] ss:$8 sps:$4 sm:$0xff]   ;;  %v336_v17 = vld [vmem:[#allocation2 + $0x10] ss:$8 sps:$4 sm:$0xff]  }
  0x15   :  { %209 = vmatprep.subr.bf16.mxu1 %v319_v6  ;;  %v337_v18 = vld [vmem:[#allocation2 + $0x4] ss:$8 sps:$4 sm:$0xff]   ;;  %v38_v20 = vand.u32 127, %v37_v19  ;;  %v339_v24 = vld [vmem:[#allocation2] ss:$8 sps:$4 sm:$0xff]   ;;  %v118_v30 = vshrl.u32 %v37_v19, 7 }
  0x16   :  { %v115_v32 = vld [vmem:[%s465_s3] sm:$0x3]  ;;  %s412_s2 = smov [#allocation5]   ;;  %s413_s30 = smov [#allocation6]  }
  0x17   :  { %v119_v31 = vsub.s32 0, %v118_v30  ;;  %v123_v33 = vsub.s32 1, %v118_v30  ;;  %s256_s29 = sshll.u32 %s412_s2, 4  ;;  %s266_s6 = sshll.u32 %s413_s30, 4  ;;  %s257_s29 = int_to_ptr.vmem [resolvable:$true] %s256_s29  ;;  %s267_s6 = int_to_ptr.vmem [resolvable:$true] %s266_s6 }
  0x18   :  { %210 = vmatpush1.bf16.msra.mxu1 %v321_v7  ;;  %s360_s7 = scalar_lea.vmem %s257_s29, 128  ;;  %p365_p6 = scmp.lt.s32.totalorder %s257_s29, %s257_s29 }
  0x19   :  { %211 = vmatprep.subr.bf16.mxu1 %v322_v8  ;;  %v120_v34 = vrot.slane %v115_v32, %v119_v31  ;;  %v124_v35 = vrot.slane %v115_v32, %v123_v33  ;;  %p361_p5 = scmp.ne.s32.totalorder %s257_s29, %s360_s7  ;;  %p366_p7 = scmp.lt.s32.totalorder %s360_s7, %s360_s7 }
  0x1b   :  { %p367_p8 = por %p366_p7, %p365_p6 }
  0x1c   :  { %212 = vmatpush1.bf16.msra.mxu1 %v324_v9 }
  0x1d   :  { %213 = vmatprep.subr.bf16.mxu1 %v325_v10  ;;  %p368_p9 = pnand %p367_p8, %p361_p5 }
  0x20   :  { %214 = vmatpush1.bf16.msra.mxu1 %v327_v11 }
  0x21   :  { %215 = vmatprep.subr.bf16.mxu1 %v328_v12 }
  0x24   :  { %216 = vmatpush1.bf16.msra.mxu1 %v330_v13 }
  0x25   :  { %217 = vmatprep.subr.bf16.mxu1 %v331_v14 }
  0x28   :  { %218 = vmatpush1.bf16.msra.mxu1 %v333_v15 }
  0x29   :  { %219 = vmatprep.subr.bf16.mxu1 %v334_v16 }
  0x2c   :  { %220 = vmatpush1.bf16.msra.mxu1 %v336_v17 }
  0x2d   :  { %221 = vmatprep.subr.bf16.mxu1 %v337_v18 }
  0x30   :  { %222 = vmatpush1.bf16.msra.mxu1 %v339_v24 }
  0x8d   :  { %v41_v21 = vpop.permute.xlu0 %40 }
  0x8e   :  { %vm42_vm1 = vcmp.eq.s32.totalorder %v41_v21, %v38_v20 }
  0x8f   :  { %v279_v22 = vsel %vm42_vm1, 1.0, %v410_v1 }
  0x90   :  { %v45_v23 = vpack.c.bf16 %v279_v22, %v279_v22 }
  0x92   :  { %303 = vmatmul.mubr.msk.bf16.vlgmr.msra.gmra.mxu0 %vm54_vm2, %v45_v23 }
 0x152   :  { %v92_v25 = vpop.f32.mrf.mxu0 }
 0x153   :  { %v98_v26 = vpack.c.bf16 %v92_v25, %v92_v25 }
 0x154   :  { %v304_v27 = vpop.f32.mrf.mxu0 }
 0x155   :  { %240 = vmatmul.mubr.bf16.vlgmr.msra.gmra.mxu1 %v98_v26 }
 0x156   :  { %v95_v28 = vpop.f32.mrf.mxu0 }
 0x158   :  { %v305_v29 = vpop.f32.mrf.mxu0 }
 0x215   :  { %v241_v36 = vpop.f32.mrf.mxu1 }
 0x216   :  { %v242_v37 = vadd.f32 %v241_v36, %v120_v34 }
 0x217   :  { %v243_v38 = vpop.f32.mrf.mxu1 }
 0x218   :  { %248 = vst [vmem:[#allocation5] sm:$0xff] %v242_v37  ;;  %v244_v39 = vadd.f32 %v243_v38, %v124_v35 }
 0x219   :  { %v245_v40 = vpop.f32.mrf.mxu1 }
 0x21a   :  { %371 = shalt.err (!%p368_p9)
}
 0x21b   :  { %259 = dma.vmem_to_hbm [thread:$0]  %s257_s29, 128, %s466_s4, [#allocation4]   ;;  %249 = vst [vmem:[#allocation6] sm:$0xff] %v244_v39  ;;  %v246_v41 = vpop.f32.mrf.mxu1 }
 0x21c   :  { %s380_s9 = scalar_lea.vmem %s267_s6, 128  ;;  %p385_p11 = scmp.lt.s32.totalorder %s267_s6, %s267_s6 }
 0x21d   :  { %p381_p10 = scmp.ne.s32.totalorder %s267_s6, %s380_s9  ;;  %p386_p12 = scmp.lt.s32.totalorder %s380_s9, %s380_s9 }
 0x21f   :  { %p387_p13 = por %p386_p12, %p385_p11 }
 0x221   :  { %p388_p0 = pnand %p387_p13, %p381_p10 }
 0x223   :  { %391 = shalt.err (!%p388_p0)
}
 0x224   :  { %269 = dma.vmem_to_hbm [thread:$0]  %s267_s6, 128, %s467_s5, [#allocation7]  }
 0x225   :  { %402 = dma.done.wait [#allocation4], 128  }
 0x226   :  { %403 = vsyncadd [#allocation4], 4294967168 }
 0x227   :  { %404 = dma.done.wait [#allocation7], 128  }
 0x228   :  { %405 = vsyncadd [#allocation7], 4294967168 }
 0x229   :  { %276 = vsyncpa [#allocation3], 1 }
 0x22a   :  { %277 = vsyncpa [#allocation4], 1 }
 0x22b   :  { %278 = vsyncpa [#allocation7], 1 }

</bundles_post_ra>
